<compile_context>
chip_gen: v7x
topology: tpu7x:2x2x1
jax: 0.10.0
libtpu: 0.0.40
codegen_flags: <defaults>
</compile_context>

<pallas_src>
import functools
import math

import jax
import jax.numpy as jnp
from jax.experimental import pallas as pl
from jax.experimental.pallas import tpu as pltpu

F32 = jnp.float32
_NORM_EPS = 1e-12   # torch.nn.functional.normalize default eps
_GN_EPS = 1e-5      # torch.nn.GroupNorm default eps


# ---------------------------------------------------------------------------
# Pallas kernels
# ---------------------------------------------------------------------------

def _linear_kernel(x_ref, w_ref, b_ref, o_ref, *, act):
    """y = act(x @ W + b).  One batch tile per grid step, weight resident."""
    x = x_ref[...].astype(F32)
    w = w_ref[...].astype(F32)
    y = jnp.dot(x, w, preferred_element_type=F32) + b_ref[...].astype(F32)
    if act == "silu":
        y = y * jax.nn.sigmoid(y)
    elif act == "gelu":
        # TODO(synk): PyTorch nn.GELU defaults to the exact erf form; erf lowering is
        # not guaranteed in Mosaic, so the tanh approximation is used inside the kernel.
        y = jax.nn.gelu(y, approximate=True)
    o_ref[...] = y.astype(o_ref.dtype)


def _block_mlp_kernel(x_ref, w_ref, b_ref, gamma_ref, beta_ref, gmat_ref, gmat_t_ref,
                      *rest, cg_recip, eps, has_ss, has_res):
    """Block_MLP fused: Linear -> GroupNorm -> x*(scale+1)+shift -> SiLU [-> +res]."""
    idx = 0
    if has_ss:
        scale_ref, shift_ref = rest[0], rest[1]
        idx = 2
    if has_res:
        res_ref = rest[idx]
        idx += 1
    o_ref = rest[idx]

    x = x_ref[...].astype(F32)
    w = w_ref[...].astype(F32)
    h = jnp.dot(x, w, preferred_element_type=F32) + b_ref[...].astype(F32)

    # Group statistics via tiny MXU matmuls with a one-hot (channels x groups) matrix
    # (avoids lane-splitting reshapes on the TPU minor dim).
    gmat = gmat_ref[...]          # (Dout, G), one-hot membership
    gmat_t = gmat_t_ref[...]      # (G, Dout)
    mean_g = jnp.dot(h, gmat, preferred_element_type=F32) * cg_recip      # (bm, G)
    mean = jnp.dot(mean_g, gmat_t, preferred_element_type=F32)            # (bm, Dout)
    d = h - mean
    var_g = jnp.dot(d * d, gmat, preferred_element_type=F32) * cg_recip
    rstd_g = jax.lax.rsqrt(var_g + eps)
    rstd = jnp.dot(rstd_g, gmat_t, preferred_element_type=F32)
    y = d * rstd * gamma_ref[...].astype(F32) + beta_ref[...].astype(F32)

    if has_ss:
        y = y * (scale_ref[...].astype(F32) + 1.0) + shift_ref[...].astype(F32)
    y = y * jax.nn.sigmoid(y)                      # SiLU
    if has_res:
        y = y + res_ref[...].astype(F32)           # ResnetBlock residual (after act)
    o_ref[...] = y.astype(o_ref.dtype)


def _rmsnorm_linear_kernel(x_ref, g_ref, w_ref, o_ref, *, eps):
    """PreNorm fused with fn's first matmul: (RMSNorm(x) * g*sqrt(D)) @ W_qkv (no bias)."""
    x = x_ref[...].astype(F32)
    ssq = jnp.sum(x * x, axis=-1, keepdims=True)
    inv = jax.lax.rsqrt(jnp.maximum(ssq, eps * eps))     # == 1 / max(||x||, eps)
    xn = x * (inv * g_ref[...].astype(F32))              # g already carries sqrt(D)
    o_ref[...] = jnp.dot(xn, w_ref[...].astype(F32),
                         preferred_element_type=F32).astype(o_ref.dtype)


def _linear_rmsnorm_res_kernel(x_ref, w_ref, b_ref, g_ref, res_ref, o_ref, *, eps):
    """Attention tail fused: (x @ W_out + b) -> RMSNorm (g*sqrt(D)) -> + residual."""
    x = x_ref[...].astype(F32)
    y = jnp.dot(x, w_ref[...].astype(F32), preferred_element_type=F32) + b_ref[...].astype(F32)
    ssq = jnp.sum(y * y, axis=-1, keepdims=True)
    inv = jax.lax.rsqrt(jnp.maximum(ssq, eps * eps))
    yn = y * (inv * g_ref[...].astype(F32))
    o_ref[...] = (yn + res_ref[...].astype(F32)).astype(o_ref.dtype)


# ---------------------------------------------------------------------------
# pallas_call wrappers (batch-tiled grid, weights replicated per step)
# ---------------------------------------------------------------------------

def _batch_tile(B):
    # Whole batch in one block when small; otherwise 256-row (8-aligned) tiles so
    # large batches still give >= 2 parallel grid steps (v7x megacore) while the
    # double-buffered blocks stay well under the 32 MiB scoped-VMEM default.
    bm = B if B <= 256 else 256
    return bm, pl.cdiv(B, bm)


def _row_spec(bm, d):
    return pl.BlockSpec((bm, d), lambda i: (i, 0))


def _rep_spec(shape):
    return pl.BlockSpec(shape, lambda i: (0, 0))


def _params(nsteps):
    return pltpu.CompilerParams(dimension_semantics=("parallel",))


def linear_pallas(x, w, b=None, act="none"):
    B, din = x.shape
    dout = w.shape[1]
    if b is None:
        b = jnp.zeros((1, dout), x.dtype)
    bm, nb = _batch_tile(B)
    return pl.pallas_call(
        functools.partial(_linear_kernel, act=act),
        out_shape=jax.ShapeDtypeStruct((B, dout), x.dtype),
        grid_spec=pltpu.PrefetchScalarGridSpec(
            num_scalar_prefetch=0, grid=(nb,),
            in_specs=[_row_spec(bm, din), _rep_spec((din, dout)), _rep_spec((1, dout))],
            out_specs=_row_spec(bm, dout)),
        compiler_params=_params(nb),
    )(x, w, b)


def block_mlp_pallas(x, w, b, gamma, beta, gmat, gmat_t,
                     scale=None, shift=None, res=None, *, groups):
    B, din = x.shape
    dout = w.shape[1]
    cg = dout // groups
    bm, nb = _batch_tile(B)
    has_ss = scale is not None
    has_res = res is not None
    in_specs = [_row_spec(bm, din), _rep_spec((din, dout)), _rep_spec((1, dout)),
                _rep_spec((1, dout)), _rep_spec((1, dout)),
                _rep_spec((dout, groups)), _rep_spec((groups, dout))]
    args = [x, w, b, gamma, beta, gmat, gmat_t]
    if has_ss:
        in_specs += [_row_spec(bm, dout), _row_spec(bm, dout)]
        args += [scale, shift]
    if has_res:
        in_specs += [_row_spec(bm, dout)]
        args += [res]
    kernel = functools.partial(_block_mlp_kernel, cg_recip=1.0 / cg, eps=_GN_EPS,
                               has_ss=has_ss, has_res=has_res)
    return pl.pallas_call(
        kernel,
        out_shape=jax.ShapeDtypeStruct((B, dout), x.dtype),
        grid_spec=pltpu.PrefetchScalarGridSpec(
            num_scalar_prefetch=0, grid=(nb,),
            in_specs=in_specs, out_specs=_row_spec(bm, dout)),
        compiler_params=_params(nb),
    )(*args)


def rmsnorm_linear_pallas(x, g_scaled, w):
    B, din = x.shape
    dout = w.shape[1]
    bm, nb = _batch_tile(B)
    return pl.pallas_call(
        functools.partial(_rmsnorm_linear_kernel, eps=_NORM_EPS),
        out_shape=jax.ShapeDtypeStruct((B, dout), x.dtype),
        grid_spec=pltpu.PrefetchScalarGridSpec(
            num_scalar_prefetch=0, grid=(nb,),
            in_specs=[_row_spec(bm, din), _rep_spec((1, din)), _rep_spec((din, dout))],
            out_specs=_row_spec(bm, dout)),
        compiler_params=_params(nb),
    )(x, g_scaled, w)


def linear_rmsnorm_res_pallas(x, w, b, g_scaled, res):
    B, din = x.shape
    dout = w.shape[1]
    bm, nb = _batch_tile(B)
    return pl.pallas_call(
        functools.partial(_linear_rmsnorm_res_kernel, eps=_NORM_EPS),
        out_shape=jax.ShapeDtypeStruct((B, dout), x.dtype),
        grid_spec=pltpu.PrefetchScalarGridSpec(
            num_scalar_prefetch=0, grid=(nb,),
            in_specs=[_row_spec(bm, din), _rep_spec((din, dout)), _rep_spec((1, dout)),
                      _rep_spec((1, dout)), _row_spec(bm, dout)],
            out_specs=_row_spec(bm, dout)),
        compiler_params=_params(nb),
    )(x, w, b, g_scaled, res)


# ---------------------------------------------------------------------------
# Model blocks (composition of the kernels; tiny glue stays in plain JAX)
# ---------------------------------------------------------------------------

def _group_matrices(dout, groups):
    cg = dout // groups
    ch = jnp.arange(dout)
    gmat = (ch[:, None] // cg == jnp.arange(groups)[None, :]).astype(F32)   # (Dout, G)
    return gmat, gmat.T


def sinusoidal_pos_emb(t, dim, theta=10000.0):
    half = dim // 2
    s = math.log(theta) / (half - 1) if half > 1 else math.log(theta) / half
    freqs = jnp.exp(jnp.arange(half, dtype=F32) * -s)
    arg = t.astype(F32)[:, None] * freqs[None, :]
    return jnp.concatenate([jnp.sin(arg), jnp.cos(arg)], axis=-1)


def resnet_block_mlp(x, silu_t, p, groups):
    # ResnetBlock_MLP.forward
    ss = linear_pallas(silu_t, p["mlp"]["w"], p["mlp"]["b"])        # (B, 2*Dout)
    scale, shift = jnp.split(ss, 2, axis=1)
    dout = p["block1"]["w"].shape[1]
    gmat, gmat_t = _group_matrices(dout, groups)
    if "res_w" in p:
        res = linear_pallas(x, p["res_w"], p["res_b"])              # res_conv
    else:
        res = x                                                     # Identity
    h = block_mlp_pallas(x, p["block1"]["w"], p["block1"]["b"],
                         p["block1"]["gamma"], p["block1"]["beta"],
                         gmat, gmat_t, scale, shift, groups=groups)
    h = block_mlp_pallas(h, p["block2"]["w"], p["block2"]["b"],
                         p["block2"]["gamma"], p["block2"]["beta"],
                         gmat, gmat_t, res=res, groups=groups)
    return h


def attention_residual(x, p, heads, dim_head):
    # Residual(PreNorm_MLP(dim, MyAttention(dim)))
    B = x.shape[0]
    qkv = rmsnorm_linear_pallas(x, p["prenorm_g"], p["w_qkv"])      # RMSNorm + to_qkv fused
    q, k, v = jnp.split(qkv, 3, axis=1)
    q = q.reshape(B, heads, dim_head)
    k = k.reshape(B, heads, dim_head)
    v = v.reshape(B, heads, dim_head)
    # TODO(synk): the degenerate seq-len-1 per-head softmax ((B, heads, dh, dh), a few
    # KB total) stays in plain JAX; it has no HBM-bandwidth impact.
    scores = jnp.einsum("bhi,bhj->bhij", q, k) * (dim_head ** -0.5)
    attn = jax.nn.softmax(scores, axis=-1)
    out = jnp.einsum("bhij,bhj->bhi", attn, v).reshape(B, heads * dim_head)
    # to_out Linear + RMSNorm + residual add fused into one kernel
    return linear_rmsnorm_res_pallas(out, p["w_out"], p["b_out"], p["out_g"], x)


# ---------------------------------------------------------------------------
# Parameter construction (deterministic, PRNGKey-based)
# ---------------------------------------------------------------------------

def _init_linear(key, din, dout):
    kw, kb = jax.random.split(key)
    s = 1.0 / math.sqrt(din)
    return {"w": jax.random.normal(kw, (din, dout), F32) * s,
            "b": jax.random.uniform(kb, (1, dout), F32, -s, s)}


def _init_resnet(key, din, dout, time_dim):
    k = jax.random.split(key, 4)
    p = {"mlp": _init_linear(k[0], time_dim, dout * 2),
         "block1": dict(_init_linear(k[1], din, dout),
                        gamma=jnp.ones((1, dout), F32), beta=jnp.zeros((1, dout), F32)),
         "block2": dict(_init_linear(k[2], dout, dout),
                        gamma=jnp.ones((1, dout), F32), beta=jnp.zeros((1, dout), F32))}
    if din != dout:
        rc = _init_linear(k[3], din, dout)
        p["res_w"], p["res_b"] = rc["w"], rc["b"]
    return p


def _init_attn(key, dim, heads, dim_head):
    hidden = heads * dim_head
    k = jax.random.split(key, 2)
    out = _init_linear(k[1], hidden, dim)
    # RMSNorm_MLP gain (init = ones) with the sqrt(dim) factor folded in (perf feedback).
    g_scaled = jnp.full((1, dim), math.sqrt(dim), F32)
    return {"prenorm_g": g_scaled,
            "w_qkv": jax.random.normal(k[0], (dim, hidden * 3), F32) / math.sqrt(dim),
            "w_out": out["w"], "b_out": out["b"],
            "out_g": g_scaled}


def init_unet_params(key, *, dim, latent_size, dim_mults, groups, heads, dim_head,
                     time_dim=128, conditioning=None, learned_variance=False, out_dim=None):
    input_channels = latent_size * (2 if conditioning == "stack" else 1)
    init_dim = dim
    dims = [init_dim] + [int(dim // m) for m in dim_mults]
    in_out = list(zip(dims[:-1], dims[1:]))
    keys = iter(jax.random.split(key, 64))
    params = {"init": _init_linear(next(keys), input_channels, init_dim),
              "time1": _init_linear(next(keys), time_dim, time_dim),   # fourier_dim == 128
              "time2": _init_linear(next(keys), time_dim, time_dim),
              "downs": [], "ups": []}
    for din, dout in in_out:
        params["downs"].append({"resnet": _init_resnet(next(keys), din, din, time_dim),
                                "attn": _init_attn(next(keys), din, heads, dim_head),
                                "down": _init_linear(next(keys), din, dout)})
    mid = dims[-1]
    params["mid1"] = _init_resnet(next(keys), mid, mid, time_dim)
    params["mid_attn"] = _init_attn(next(keys), mid, heads, dim_head)
    params["mid2"] = _init_resnet(next(keys), mid, mid, time_dim)
    for din, dout in reversed(in_out):
        params["ups"].append({"resnet": _init_resnet(next(keys), dout + din, dout, time_dim),
                              "attn": _init_attn(next(keys), dout, heads, dim_head),
                              "up": _init_linear(next(keys), dout, din)})
    final_out = out_dim if out_dim is not None else latent_size * (2 if learned_variance else 1)
    params["final"] = _init_linear(next(keys), dim, final_out)
    return params


# ---------------------------------------------------------------------------
# Full forward pass (mirrors Unet1D_MLP_light.forward)
# ---------------------------------------------------------------------------

def unet1d_mlp_forward(params, x, time, proto=None, *, groups, heads, dim_head,
                       conditioning=None, latent_size=None, time_emb_dim=128):
    if conditioning == "stack" and proto is not None:
        proto = proto.reshape(-1, latent_size)
        x = jnp.concatenate([proto, x], axis=1)

    x = linear_pallas(x, params["init"]["w"], params["init"]["b"])      # init_conv
    r = x  # kept for parity with the reference (unused there as well)

    temb = sinusoidal_pos_emb(time, time_emb_dim)                       # SinusoidalPosEmb(128)
    t = linear_pallas(temb, params["time1"]["w"], params["time1"]["b"], act="gelu")
    t = linear_pallas(t, params["time2"]["w"], params["time2"]["b"])
    silu_t = jax.nn.silu(t)   # shared SiLU(t) feeding every ResnetBlock time-MLP

    hs = []
    for d in params["downs"]:
        x = resnet_block_mlp(x, silu_t, d["resnet"], groups)
        x = attention_residual(x, d["attn"], heads, dim_head)
        hs.append(x)
        x = linear_pallas(x, d["down"]["w"], d["down"]["b"])            # DownsampleMLP

    x = resnet_block_mlp(x, silu_t, params["mid1"], groups)
    x = attention_residual(x, params["mid_attn"], heads, dim_head)
    x = resnet_block_mlp(x, silu_t, params["mid2"], groups)

    for u in params["ups"]:
        x = jnp.concatenate([x, hs.pop()], axis=1)
        x = resnet_block_mlp(x, silu_t, u["resnet"], groups)
        x = attention_residual(x, u["attn"], heads, dim_head)
        x = linear_pallas(x, u["up"]["w"], u["up"]["b"])                # UpsampleMLP

    return linear_pallas(x, params["final"]["w"], params["final"]["b"])  # final_conv


# ---------------------------------------------------------------------------
# Self-test
# ---------------------------------------------------------------------------

if __name__ == "__main__":
    key = jax.random.PRNGKey(0)
    B, DIM, LATENT = 2, 32, 64
    DIM_MULTS, GROUPS, HEADS, DIM_HEAD = (1, 2), 8, 4, 32

    kp, kx, kt = jax.random.split(key, 3)
    params = init_unet_params(kp, dim=DIM, latent_size=LATENT, dim_mults=DIM_MULTS,
                              groups=GROUPS, heads=HEADS, dim_head=DIM_HEAD)
    x = jax.random.normal(kx, (B, LATENT), F32)
    time = jax.random.uniform(kt, (B,), F32, 0.0, 100.0)

    out = unet1d_mlp_forward(params, x, time, groups=GROUPS, heads=HEADS, dim_head=DIM_HEAD)
    out = jax.block_until_ready(out)
    assert out.shape == (B, LATENT), out.shape
    assert bool(jnp.all(jnp.isfinite(out))), "non-finite output"

    # ---- kernel-level sanity checks against plain-JAX references ----------
    def _hdot(a, b):
        return jnp.dot(a, b, precision=jax.lax.Precision.HIGHEST)

    kk = jax.random.split(jax.random.PRNGKey(1), 8)

    # fused PreNorm(RMSNorm) + to_qkv
    xa = jax.random.normal(kk[0], (B, DIM), F32)
    ga = jnp.full((1, DIM), math.sqrt(DIM), F32)
    wa = jax.random.normal(kk[1], (DIM, HEADS * DIM_HEAD * 3), F32) / math.sqrt(DIM)
    got = rmsnorm_linear_pallas(xa, ga, wa)
    xn = xa / jnp.maximum(jnp.linalg.norm(xa, axis=-1, keepdims=True), _NORM_EPS) * ga
    ref = _hdot(xn, wa)
    assert jnp.allclose(got, ref, atol=2e-2, rtol=2e-2), "rmsnorm_linear mismatch"

    # fused Block_MLP (Linear + GroupNorm + scale/shift + SiLU)
    wb = jax.random.normal(kk[2], (DIM, DIM), F32) / math.sqrt(DIM)
    bb = jnp.zeros((1, DIM), F32)
    gamma, beta = jnp.ones((1, DIM), F32), jnp.zeros((1, DIM), F32)
    gmat, gmat_t = _group_matrices(DIM, GROUPS)
    sc = jax.random.normal(kk[3], (B, DIM), F32) * 0.1
    sh = jax.random.normal(kk[4], (B, DIM), F32) * 0.1
    got = block_mlp_pallas(xa, wb, bb, gamma, beta, gmat, gmat_t, sc, sh, groups=GROUPS)
    hh = _hdot(xa, wb) + bb
    hg = hh.reshape(B, GROUPS, DIM // GROUPS)
    mu = hg.mean(-1, keepdims=True)
    var = ((hg - mu) ** 2).mean(-1, keepdims=True)
    yy = ((hg - mu) / jnp.sqrt(var + _GN_EPS)).reshape(B, DIM) * gamma + beta
    yy = yy * (sc + 1.0) + sh
    yy = yy * jax.nn.sigmoid(yy)
    assert jnp.allclose(got, yy, atol=2e-2, rtol=2e-2), "block_mlp mismatch"

    # fused to_out Linear + RMSNorm + residual
    wo = jax.random.normal(kk[5], (HEADS * DIM_HEAD, DIM), F32) / math.sqrt(HEADS * DIM_HEAD)
    bo = jnp.zeros((1, DIM), F32)
    xo = jax.random.normal(kk[6], (B, HEADS * DIM_HEAD), F32)
    got = linear_rmsnorm_res_pallas(xo, wo, bo, ga, xa)
    yo = _hdot(xo, wo) + bo
    yo = yo / jnp.maximum(jnp.linalg.norm(yo, axis=-1, keepdims=True), _NORM_EPS) * ga + xa
    assert jnp.allclose(got, yo, atol=2e-2, rtol=2e-2), "linear_rmsnorm_res mismatch"

    print("KERNEL_OK")
</pallas_src>

<mosaic_0001>
module attributes {stable_mosaic.version = 11 : i64} {
  func.func @_linear_kernel(%arg0: i32, %arg1: memref<2x64xf32, #tpu.memory_space<vmem>>, %arg2: memref<64x32xf32, #tpu.memory_space<vmem>>, %arg3: memref<1x32xf32, #tpu.memory_space<vmem>>, %arg4: memref<2x32xf32, #tpu.memory_space<vmem>>) attributes {dimension_semantics = [#tpu.dimension_semantics<parallel>], iteration_bounds = array<i64: 1>, scalar_prefetch = 0 : i64, scratch_operands = 0 : i64, tpu.core_type = #tpu.core_type<tc>, window_params = [{transform_indices = @transform_0, window_bounds = array<i64: 2, 64>}, {pipeline_mode = #tpu.pipeline_mode<synchronous>, transform_indices = @transform_1, window_bounds = array<i64: 64, 32>}, {pipeline_mode = #tpu.pipeline_mode<synchronous>, transform_indices = @transform_2, window_bounds = array<i64: 1, 32>}, {transform_indices = @transform_3, window_bounds = array<i64: 2, 32>}]} {
    %c0 = arith.constant 0 : index
    %c0_0 = arith.constant 0 : index
    %0 = vector.load %arg1[%c0, %c0_0] : memref<2x64xf32, #tpu.memory_space<vmem>>, vector<2x64xf32>
    %c0_1 = arith.constant 0 : index
    %c0_2 = arith.constant 0 : index
    %1 = vector.load %arg2[%c0_1, %c0_2] : memref<64x32xf32, #tpu.memory_space<vmem>>, vector<64x32xf32>
    %cst = arith.constant dense<0.000000e+00> : vector<2x32xf32>
    %2 = tpu.matmul %0, %1, %cst {dimension_numbers = #tpu.dot_dimension_numbers<[1], [0], [0], [1], [0, 0, 1, 1], [], []>} : vector<2x64xf32>, vector<64x32xf32>, vector<2x32xf32> -> vector<2x32xf32>
    %c0_3 = arith.constant 0 : index
    %c0_4 = arith.constant 0 : index
    %3 = vector.load %arg3[%c0_3, %c0_4] : memref<1x32xf32, #tpu.memory_space<vmem>>, vector<1x32xf32>
    %4 = vector.broadcast %3 : vector<1x32xf32> to vector<2x32xf32>
    %5 = arith.addf %2, %4 : vector<2x32xf32>
    %c0_5 = arith.constant 0 : index
    %c0_6 = arith.constant 0 : index
    %6 = vector.load %arg4[%c0_5, %c0_6] : memref<2x32xf32, #tpu.memory_space<vmem>>, vector<2x32xf32>
    tpu.vector_store %arg4[%c0_5, %c0_6], %5 {strides = array<i32>} : memref<2x32xf32, #tpu.memory_space<vmem>>, vector<2x32xf32>,
    return
  }
  func.func @transform_0(%arg0: i32) -> (i32, i32) {
    %c0_i32 = arith.constant 0 : i32
    %c0_i32_0 = arith.constant 0 : i32
    return %arg0, %c0_i32 : i32, i32
  }
  func.func @transform_1(%arg0: i32) -> (i32, i32) {
    %c0_i32 = arith.constant 0 : i32
    %c0_i32_0 = arith.constant 0 : i32
    %c0_i32_1 = arith.constant 0 : i32
    return %c0_i32, %c0_i32_0 : i32, i32
  }
  func.func @transform_2(%arg0: i32) -> (i32, i32) {
    %c0_i32 = arith.constant 0 : i32
    %c0_i32_0 = arith.constant 0 : i32
    %c0_i32_1 = arith.constant 0 : i32
    return %c0_i32, %c0_i32_0 : i32, i32
  }
  func.func @transform_3(%arg0: i32) -> (i32, i32) {
    %c0_i32 = arith.constant 0 : i32
    %c0_i32_0 = arith.constant 0 : i32
    return %arg0, %c0_i32 : i32, i32
  }
}

</mosaic_0001>

<bundles_post_ra>
// kernel: tpu_custom_call.1
= control target key start
LH: loop header
LB: loop body
LE: loop exit
PB: predicated region body
PF: predicated region fallthrough
CT: control target
= control target key end

     0   :  { %v191_v3 = vmov 0.0|0.0   ;;  %vm192_vm0 = vmmov 0   ;;  %v193_v6 = vmov 0.0   ;;  %s257_s0 = inlined_call_operand.vmem [shape: f32[2,64], index: 0, kind: input, shape index: {}]   ;;  %s258_s1 = inlined_call_operand.vmem [shape: f32[64,32], index: 1, kind: input, shape index: {}]   ;;  %s259_s2 = inlined_call_operand.vmem [shape: f32[1,32], index: 2, kind: input, shape index: {}]   ;;  %s260_s3 = inlined_call_operand.hbm [shape: f32[2,32], index: 3, kind: output, shape index: {}]  }
   0x1   :  { %v16_v0 = vld [vmem:[%s258_s1] sm:$0xff]  ;;  %v17_v1 = vld [vmem:[%s258_s1 + $0x8] sm:$0xff]  ;;  %v18_v2 = vld [vmem:[%s258_s1 + $0x10] sm:$0xff]  ;;  %151 = vmatprep.subr.bf16.mxu0 %v191_v3  ;;  %148 = vmatprep.mubr.msk.f32.mxu0 %vm192_vm0, %v193_v6 }
   0x2   :  { %v152_v4 = vpack.c.bf16 %v17_v1, %v16_v0  ;;  %v19_v5 = vld [vmem:[%s258_s1 + $0x18] sm:$0xff] }
   0x3   :  { %v155_v7 = vpack.c.bf16 %v19_v5, %v18_v2 }
   0x4   :  { %153 = vmatpush3.bf16.msra.mxu0 %v152_v4 }
   0x5   :  { %8 = vsyncpa [#allocation3], 0  ;;  %154 = vmatprep.subr.bf16.mxu0 %v191_v3  ;;  %v20_v8 = vld [vmem:[%s258_s1 + $0x20] sm:$0xff]  ;;  %v21_v9 = vld [vmem:[%s258_s1 + $0x28] sm:$0xff]  ;;  %vm31_vm1 = vcmask 523264   ;;  %s194_s5 = smov [#allocation2]  }
   0x6   :  { %v158_v10 = vpack.c.bf16 %v21_v9, %v20_v8  ;;  %v22_v11 = vld [vmem:[%s258_s1 + $0x30] sm:$0xff]  ;;  %v23_v12 = vld [vmem:[%s258_s1 + $0x38] sm:$0xff]  ;;  %v15_v14 = vld [vmem:[%s257_s0] sm:$0x3]  ;;  %s113_s6 = sshll.u32 %s194_s5, 4  ;;  %vm105_vm2 = vcmask 254976   ;;  %s114_s6 = int_to_ptr.vmem [resolvable:$true] %s113_s6 }
   0x7   :  { %v161_v13 = vpack.c.bf16 %v23_v12, %v22_v11  ;;  %v121_v15 = vld [vmem:[%s259_s2] ss:$0 sm:$0xff]  ;;  %s167_s1 = scalar_lea.vmem %s114_s6, 32  ;;  %p172_p1 = scmp.lt.s32.totalorder %s114_s6, %s114_s6 }
   0x8   :  { %156 = vmatpush3.bf16.msra.mxu0 %v155_v7  ;;  %p168_p0 = scmp.ne.s32.totalorder %s114_s6, %s167_s1  ;;  %p173_p2 = scmp.lt.s32.totalorder %s167_s1, %s167_s1 }
   0x9   :  { %157 = vmatprep.subr.bf16.mxu0 %v191_v3 }
   0xa   :  { %p174_p3 = por %p173_p2, %p172_p1 }
   0xc   :  { %159 = vmatpush3.bf16.msra.mxu0 %v158_v10  ;;  %p175_p4 = pnand %p174_p3, %p168_p0 }
   0xd   :  { %160 = vmatprep.subr.bf16.mxu0 %v191_v3 }
  0x10   :  { %162 = vmatpush3.bf16.msra.mxu0 %v161_v13 }
  0x13   :  { %149 = vmatmul.mubr.msk.f32.vlgmr.msra.gmra.mrb[0].mxu0 %vm31_vm1, %v15_v14 }
  0xe6   :  { %v101_v16 = vpop.f32.mrb[0].mxu0 }
  0xe7   :  { %v102_v17 = vadd.f32 %v121_v15, %v101_v16  ;;  %v150_v18 = vpop.f32.mrb[1].mxu0 }
  0xe9   :  { %106 = vst.msk [vmem:[#allocation2] sm:$0x3] %vm105_vm2, %v102_v17 }
  0xea   :  { %178 = shalt.err (!%p175_p4)
}
  0xeb   :  { %s179_s8 = scalar_lea.hbm %s260_s3, 32 }
  0xec   :  { %p180_p5 = scmp.ne.s32.totalorder %s260_s3, %s179_s8  ;;  %p183_p6 = scmp.lt.u32.totalorder %s179_s8, %s260_s3 }
  0xee   :  { %p185_p7 = pnand %p183_p6, %p180_p5 }
  0xf0   :  { %188 = shalt.err (!%p185_p7)
}
  0xf1   :  { %116 = dma.vmem_to_hbm [thread:$0]  %s114_s6, 32, %s260_s3, [#allocation3]  }
  0xf2   :  { %189 = dma.done.wait [#allocation3], 32  }
  0xf3   :  { %190 = vsyncadd [#allocation3], 4294967264 }
  0xf4   :  { %120 = vsyncpa [#allocation3], 1 }

</bundles_post_ra>
